<compile_context>
chip_gen: v6e
topology: v6e:2x2x1
jax: 0.10.0
libtpu: 0.0.40
codegen_flags: <defaults>
</compile_context>

<pallas_src>
import jax
import jax.numpy as jnp
from jax.experimental import pallas as pl
from jax.experimental.pallas import tpu as pltpu

# --- module constants (small, synthetic) ---
BASELINE_MODEL_DIMENSION = 32          # MD
BASELINE_MODEL_NUMBER_OF_HEADS = 4     # NH
MAX_LEN = 16
HIDDEN = 64

MD = BASELINE_MODEL_DIMENSION
NH = BASELINE_MODEL_NUMBER_OF_HEADS
HD = MD // NH                          # 8
D_IN = MAX_LEN * MD                    # 512
D_OUT = MAX_LEN * HD                   # 128


def _fused_heads_ff_kernel(x_ref, w1_ref, b1_ref, keep_ref, w2_ref, b2_ref, om_ref, o_ref):
    """Single step: all NH heads' feed-forward substitutes, fully fused (two MXU dots)."""
    B = x_ref.shape[0]
    # Layer 1, all heads fused on the MXU N axis: (B, D_IN) @ (D_IN, NH*HIDDEN) -> (B, NH*HIDDEN).
    h = jnp.dot(x_ref[...], w1_ref[...], preferred_element_type=jnp.float32)
    h = jnp.maximum(h + b1_ref[...], 0.0)                       # bias + ReLU, f32 VPU
    # Expand to b-major block rows: rows [b*NH : (b+1)*NH] carry h[b] with only the head-th
    # HIDDEN-wide lane block kept; keep_ref is the precomputed (NH, NH*HIDDEN) 0/1 block mask,
    # so one broadcast-multiply per batch row does both the sublane broadcast and the masking.
    hb = jnp.concatenate([h[b:b + 1, :] * keep_ref[...] for b in range(B)], axis=0)
    # Layer 2, all heads in ONE dot: (NH*B, NH*HIDDEN) @ (NH*HIDDEN, D_OUT) -> (NH*B, D_OUT),
    # which is exactly one f32 (8,128) vreg -> single dense store after bias + output mask.
    y = jnp.dot(hb, w2_ref[...], preferred_element_type=jnp.float32)
    o_ref[...] = (y + b2_ref[...]) * om_ref[...]


def pack_ff_params(w1, b1, w2, b2):
    """Repack the per-head FF weights into kernel layout. Call ONCE (hoisted out of forward)."""
    # W1 with heads concatenated along N: columns [h*HIDDEN:(h+1)*HIDDEN] == w1[h].
    w1_cat = jnp.transpose(w1, (1, 0, 2)).reshape(D_IN, NH * HIDDEN).astype(jnp.float32)
    b1_row = b1.reshape(1, NH * HIDDEN).astype(jnp.float32)
    # W2 with heads stacked along K: rows [h*HIDDEN:(h+1)*HIDDEN] == w2[h].
    w2_stack = w2.reshape(NH * HIDDEN, D_OUT).astype(jnp.float32)
    b2_p = b2.astype(jnp.float32)                               # (NH, D_OUT)
    # Block-diagonal keep mask: keep[h, c] = 1 iff lane c belongs to head h's HIDDEN block.
    head_row = jnp.arange(NH, dtype=jnp.int32)[:, None]
    head_col = jnp.arange(NH * HIDDEN, dtype=jnp.int32)[None, :] // HIDDEN
    keep = (head_row == head_col).astype(jnp.float32)           # (NH, NH*HIDDEN)
    return w1_cat, b1_row, keep, w2_stack, b2_p


@jax.jit
def attention_substitute_separate_heads(value, mask, w1_cat, b1_row, keep, w2_stack, b2_p):
    """value: (B, S, MD) f32; mask: (B, 1, 1, S) bool. Returns (B, NH, S, HD) f32.

    (query/key of the original forward are ignored by the module, so they are not taken here.)
    Assumes S <= MAX_LEN, as the PyTorch module does.
    """
    B, S, _ = value.shape

    # ---- glue (pure JAX, fused by XLA): pad, fold input mask into x, build output mask/bias ----
    m_pad = jnp.pad(mask[:, 0, 0, :].astype(jnp.float32), ((0, 0), (0, MAX_LEN - S)))  # (B, MAX_LEN)
    v_pad = jnp.pad(value.astype(jnp.float32), ((0, 0), (0, MAX_LEN - S), (0, 0)))     # (B, MAX_LEN, MD)
    # `inputs * mask` of the PyTorch code, folded into the wrapper glue.
    x = (v_pad * m_pad[:, :, None]).reshape(B, D_IN)                                   # (B, D_IN)

    # Per-head output mask (mask.reshape(B, MAX_LEN*HD, NH).transpose(1,2)[:, h]) is identical
    # for every head (relies on MD == NH*HD): the position mask repeated HD times. Tile it to
    # the b-major (B*NH, D_OUT) output layout (row = b*NH + head).
    om = jnp.repeat(m_pad, HD, axis=1)                     # (B, D_OUT)
    om_tiled = jnp.repeat(om, NH, axis=0)                  # (B*NH, D_OUT), b-major
    b2_tiled = jnp.tile(b2_p, (B, 1))                      # (B*NH, D_OUT), row -> b2[row % NH]

    # ---- Pallas kernel: one fused, gridless step for all heads ----
    vmem = pl.BlockSpec(memory_space=pltpu.MemorySpace.VMEM)
    out = pl.pallas_call(
        _fused_heads_ff_kernel,
        out_shape=jax.ShapeDtypeStruct((B * NH, D_OUT), jnp.float32),
        in_specs=[vmem] * 7,
        out_specs=vmem,
    )(x, w1_cat, b1_row, keep, w2_stack, b2_tiled, om_tiled)   # (B*NH, D_OUT), b-major

    # ---- epilogue: pure reshape + slice (no transpose) ----
    return out.reshape(B, NH, MAX_LEN, HD)[:, :, :S, :]


def _reference(value, mask, w1, b1, w2, b2):
    """Pure-JAX f32 reference of the same forward (HIGHEST-precision matmuls)."""
    B, S, _ = value.shape
    v_pad = jnp.concatenate([value, jnp.zeros((B, MAX_LEN - S, MD), value.dtype)], axis=1)
    m = mask[:, 0, 0, :]
    m = jnp.concatenate([m, jnp.zeros((B, MAX_LEN - S), dtype=bool)], axis=1)
    in_mask = jnp.repeat(m, MD, axis=1).astype(jnp.float32)              # (B, D_IN)
    x = v_pad.reshape(B, D_IN) * in_mask
    out_mask = jnp.transpose(in_mask.reshape(B, D_OUT, NH), (0, 2, 1))   # (B, NH, D_OUT)
    hp = jax.lax.Precision.HIGHEST
    outs = []
    for h in range(NH):
        hid = jnp.maximum(jnp.dot(x, w1[h], precision=hp) + b1[h], 0.0)
        outs.append((jnp.dot(hid, w2[h], precision=hp) + b2[h]) * out_mask[:, h])
    out = jnp.stack(outs, axis=1).reshape(B, NH, MAX_LEN, HD)
    return out[:, :, :S, :]


if __name__ == "__main__":
    B, S = 2, 8
    key = jax.random.PRNGKey(0)
    k_val, k_w1, k_b1, k_w2, k_b2 = jax.random.split(key, 5)

    value = jax.random.normal(k_val, (B, S, MD), dtype=jnp.float32)
    # deterministic boolean mask (B, 1, 1, S): first len_b positions valid
    lens = jnp.array([6, 8], dtype=jnp.int32)
    mask = (jnp.arange(S)[None, :] < lens[:, None])[:, None, None, :]    # (B,1,1,S) bool

    # deterministic per-head FF parameters
    w1 = jax.random.normal(k_w1, (NH, D_IN, HIDDEN), dtype=jnp.float32) * 0.05
    b1 = jax.random.normal(k_b1, (NH, HIDDEN), dtype=jnp.float32) * 0.05
    w2 = jax.random.normal(k_w2, (NH, HIDDEN, D_OUT), dtype=jnp.float32) * 0.05
    b2 = jax.random.normal(k_b2, (NH, D_OUT), dtype=jnp.float32) * 0.05

    # Weight repack hoisted: done once, NOT per forward call.
    packed = pack_ff_params(w1, b1, w2, b2)
    packed = jax.tree_util.tree_map(jax.block_until_ready, packed)

    out = attention_substitute_separate_heads(value, mask, *packed)
    out = jax.block_until_ready(out)
    assert out.shape == (B, NH, S, HD), out.shape

    # numerical check against the full-f32 module semantics
    ref = _reference(value, mask, w1, b1, w2, b2)
    max_err = float(jnp.max(jnp.abs(out - ref)))
    assert jnp.allclose(out, ref, atol=2e-2, rtol=2e-2), max_err

    # masked (invalid) positions must be exactly zero (output mask applied in-kernel)
    valid = jnp.arange(S)[None, :] < lens[:, None]                       # (B, S)
    leak = jnp.where(valid[:, None, :, None], 0.0, out)
    assert float(jnp.max(jnp.abs(leak))) == 0.0

    print("KERNEL_OK")
</pallas_src>

<mosaic_0001>
module attributes {stable_mosaic.version = 11 : i64} {
  func.func @_fused_heads_ff_kernel(%arg0: memref<2x512xf32, #tpu.memory_space<vmem>>, %arg1: memref<512x256xf32, #tpu.memory_space<vmem>>, %arg2: memref<1x256xf32, #tpu.memory_space<vmem>>, %arg3: memref<4x256xf32, #tpu.memory_space<vmem>>, %arg4: memref<256x128xf32, #tpu.memory_space<vmem>>, %arg5: memref<8x128xf32, #tpu.memory_space<vmem>>, %arg6: memref<8x128xf32, #tpu.memory_space<vmem>>, %arg7: memref<8x128xf32, #tpu.memory_space<vmem>>) attributes {dimension_semantics = [], scalar_prefetch = 0 : i64, scratch_operands = 0 : i64, tpu.core_type = #tpu.core_type<tc>} {
    %c0 = arith.constant 0 : index
    %c0_0 = arith.constant 0 : index
    %0 = vector.load %arg0[%c0, %c0_0] : memref<2x512xf32, #tpu.memory_space<vmem>>, vector<2x512xf32>
    %c0_1 = arith.constant 0 : index
    %c0_2 = arith.constant 0 : index
    %1 = vector.load %arg1[%c0_1, %c0_2] : memref<512x256xf32, #tpu.memory_space<vmem>>, vector<512x256xf32>
    %cst = arith.constant dense<0.000000e+00> : vector<2x256xf32>
    %2 = tpu.matmul %0, %1, %cst {dimension_numbers = #tpu.dot_dimension_numbers<[1], [0], [0], [1], [0, 0, 1, 1], [], []>} : vector<2x512xf32>, vector<512x256xf32>, vector<2x256xf32> -> vector<2x256xf32>
    %c0_3 = arith.constant 0 : index
    %c0_4 = arith.constant 0 : index
    %3 = vector.load %arg2[%c0_3, %c0_4] : memref<1x256xf32, #tpu.memory_space<vmem>>, vector<1x256xf32>
    %4 = vector.broadcast %3 : vector<1x256xf32> to vector<2x256xf32>
    %5 = arith.addf %2, %4 : vector<2x256xf32>
    %cst_5 = arith.constant 0.000000e+00 : f32
    %6 = vector.broadcast %cst_5 : f32 to vector<2x256xf32>
    %7 = arith.maximumf %5, %6 : vector<2x256xf32>
    %8 = vector.extract_strided_slice %7 {offsets = [0, 0], sizes = [1, 256], strides = [1, 1]} : vector<2x256xf32> to vector<1x256xf32>
    %c0_6 = arith.constant 0 : index
    %c0_7 = arith.constant 0 : index
    %9 = vector.load %arg3[%c0_6, %c0_7] : memref<4x256xf32, #tpu.memory_space<vmem>>, vector<4x256xf32>
    %10 = vector.broadcast %8 : vector<1x256xf32> to vector<4x256xf32>
    %11 = arith.mulf %10, %9 : vector<4x256xf32>
    %12 = vector.extract_strided_slice %7 {offsets = [1, 0], sizes = [1, 256], strides = [1, 1]} : vector<2x256xf32> to vector<1x256xf32>
    %c0_8 = arith.constant 0 : index
    %c0_9 = arith.constant 0 : index
    %13 = vector.load %arg3[%c0_8, %c0_9] : memref<4x256xf32, #tpu.memory_space<vmem>>, vector<4x256xf32>
    %14 = vector.broadcast %12 : vector<1x256xf32> to vector<4x256xf32>
    %15 = arith.mulf %14, %13 : vector<4x256xf32>
    %16 = tpu.concatenate %11, %15 in 0 : vector<4x256xf32>, vector<4x256xf32> -> vector<8x256xf32>
    %c0_10 = arith.constant 0 : index
    %c0_11 = arith.constant 0 : index
    %17 = vector.load %arg4[%c0_10, %c0_11] : memref<256x128xf32, #tpu.memory_space<vmem>>, vector<256x128xf32>
    %cst_12 = arith.constant dense<0.000000e+00> : vector<8x128xf32>
    %18 = tpu.matmul %16, %17, %cst_12 {dimension_numbers = #tpu.dot_dimension_numbers<[1], [0], [0], [1], [0, 0, 1, 1], [], []>} : vector<8x256xf32>, vector<256x128xf32>, vector<8x128xf32> -> vector<8x128xf32>
    %c0_13 = arith.constant 0 : index
    %c0_14 = arith.constant 0 : index
    %19 = vector.load %arg5[%c0_13, %c0_14] : memref<8x128xf32, #tpu.memory_space<vmem>>, vector<8x128xf32>
    %20 = arith.addf %18, %19 : vector<8x128xf32>
    %c0_15 = arith.constant 0 : index
    %c0_16 = arith.constant 0 : index
    %21 = vector.load %arg6[%c0_15, %c0_16] : memref<8x128xf32, #tpu.memory_space<vmem>>, vector<8x128xf32>
    %22 = arith.mulf %20, %21 : vector<8x128xf32>
    %c0_17 = arith.constant 0 : index
    %c0_18 = arith.constant 0 : index
    %23 = vector.load %arg7[%c0_17, %c0_18] : memref<8x128xf32, #tpu.memory_space<vmem>>, vector<8x128xf32>
    tpu.vector_store %arg7[%c0_17, %c0_18], %22 {strides = array<i32>} : memref<8x128xf32, #tpu.memory_space<vmem>>, vector<8x128xf32>,
    return
  }
}

</mosaic_0001>

<bundles_post_ra>
// kernel: attention_substitute_separate_heads.1
= control target key start
LH: loop header
LB: loop body
LE: loop exit
PB: predicated region body
PF: predicated region fallthrough
CT: control target
= control target key end

     0   :  { %12 = vsyncpa [#allocation3], 0  ;;  %s670_s0 = inlined_call_operand.vmem [shape: f32[2,512], index: 0, kind: input, shape index: {}]   ;;  %s671_s1 = inlined_call_operand.hbm [shape: f32[512,256], index: 1, kind: input, shape index: {}]   ;;  %s672_s2 = inlined_call_operand.vmem [shape: f32[1,256], index: 2, kind: input, shape index: {}]   ;;  %s673_s3 = inlined_call_operand.vmem [shape: f32[4,256], index: 3, kind: input, shape index: {}]   ;;  %s674_s4 = inlined_call_operand.hbm [shape: f32[256,128], index: 4, kind: input, shape index: {}]   ;;  %s675_s5 = inlined_call_operand.vmem [shape: f32[8,128], index: 5, kind: input, shape index: {}]   ;;  %s676_s6 = inlined_call_operand.vmem [shape: f32[8,128], index: 6, kind: input, shape index: {}]   ;;  %s677_s7 = inlined_call_operand.vmem [shape: f32[8,128], index: 7, kind: output, shape index: {}]  }
   0x1   :  { %13 = vsyncpa [#allocation5], 0  ;;  %s594_s24 = smov [#allocation2]  }
   0x2   :  { %s21_s25 = sshll.u32 %s594_s24, 4  ;;  %s22_s25 = int_to_ptr.vmem [resolvable:$true] %s21_s25 }
   0x3   :  { %s558_s26 = scalar_lea.vmem %s22_s25, 16384  ;;  %p563_p1 = scmp.lt.s32.totalorder %s22_s25, %s22_s25 }
   0x4   :  { %p559_p0 = scmp.ne.s32.totalorder %s22_s25, %s558_s26  ;;  %p564_p2 = scmp.lt.s32.totalorder %s558_s26, %s558_s26 }
   0x6   :  { %p565_p3 = por %p564_p2, %p563_p1 }
   0x8   :  { %p566_p4 = pnand %p565_p3, %p559_p0 }
   0xa   :  { %569 = shalt.err (!%p566_p4)
}
   0xb   :  { %s595_s27 = smov 256   ;;  %s596_s28 = smov 16  }
   0xc   :  { %27 = dma.hbm_to_vmem [thread:$0]  %s671_s1, 16384, %s22_s25, [#allocation3], %s595_s27, %s595_s27, %s596_s28  }
   0xd   :  { %s597_s8 = smov [#allocation4]  }
   0xe   :  { %s37_s9 = sshll.u32 %s597_s8, 4  ;;  %s38_s9 = int_to_ptr.vmem [resolvable:$true] %s37_s9 }
   0xf   :  { %s578_s10 = scalar_lea.vmem %s38_s9, 4096  ;;  %p583_p6 = scmp.lt.s32.totalorder %s38_s9, %s38_s9 }
  0x10   :  { %p579_p5 = scmp.ne.s32.totalorder %s38_s9, %s578_s10  ;;  %p584_p7 = scmp.lt.s32.totalorder %s578_s10, %s578_s10 }
  0x12   :  { %p585_p8 = por %p584_p7, %p583_p6 }
  0x14   :  { %p586_p9 = pnand %p585_p8, %p579_p5 }
  0x16   :  { %589 = shalt.err (!%p586_p9)
}
  0x17   :  { %s598_s11 = smov 128   ;;  %s599_s12 = smov 8  }
  0x18   :  { %43 = dma.hbm_to_vmem [thread:$0]  %s674_s4, 4096, %s38_s9, [#allocation5], %s598_s11, %s598_s11, %s599_s12  }
  0x19   :  { %590 = dma.done.wait [#allocation3], 16384  }
  0x1a   :  { %591 = vsyncadd [#allocation3], 4294950912 }
  0x1b   :  { %592 = dma.done.wait [#allocation5], 4096  }
  0x1c   :  { %593 = vsyncadd [#allocation5], 4294963200  ;;  %v86_v0 = vld [vmem:[#allocation2 + $0xf8] sm:$0xff]  ;;  %v85_v2 = vld [vmem:[#allocation2 + $0xf0] sm:$0xff]  ;;  %vm391_vm0 = vcmask 1043456  }
  0x1d   :  { %v150_v1 = vld [vmem:[#allocation2 + $0x2f8] sm:$0xff]  ;;  %217 = vmatprep.subr.mxu0 %v86_v0  ;;  %v149_v3 = vld [vmem:[#allocation2 + $0x2f0] sm:$0xff]  ;;  %v84_v4 = vld [vmem:[#allocation2 + $0xe8] sm:$0xff] }
  0x1e   :  { %288 = vmatprep.subr.mxu1 %v150_v1  ;;  %v148_v5 = vld [vmem:[#allocation2 + $0x2e8] sm:$0xff]  ;;  %218 = vmatpush1.msra.mxu0 %v85_v2  ;;  %v83_v6 = vld [vmem:[#allocation2 + $0xe0] sm:$0xff]  ;;  %v82_v8 = vld [vmem:[#allocation2 + $0xd8] sm:$0xff] }
  0x1f   :  { %289 = vmatpush1.msra.mxu1 %v149_v3  ;;  %v147_v7 = vld [vmem:[#allocation2 + $0x2e0] sm:$0xff]  ;;  %219 = vmatprep.subr.mxu0 %v84_v4  ;;  %v146_v9 = vld [vmem:[#allocation2 + $0x2d8] sm:$0xff]  ;;  %v81_v10 = vld [vmem:[#allocation2 + $0xd0] sm:$0xff] }
  0x20   :  { %290 = vmatprep.subr.mxu1 %v148_v5  ;;  %v145_v11 = vld [vmem:[#allocation2 + $0x2d0] sm:$0xff]  ;;  %220 = vmatpush1.msra.mxu0 %v83_v6  ;;  %v80_v12 = vld [vmem:[#allocation2 + $0xc8] sm:$0xff]  ;;  %v79_v14 = vld [vmem:[#allocation2 + $0xc0] sm:$0xff] }
  0x21   :  { %291 = vmatpush1.msra.mxu1 %v147_v7  ;;  %v144_v13 = vld [vmem:[#allocation2 + $0x2c8] sm:$0xff]  ;;  %221 = vmatprep.subr.mxu0 %v82_v8  ;;  %v143_v15 = vld [vmem:[#allocation2 + $0x2c0] sm:$0xff]  ;;  %v78_v16 = vld [vmem:[#allocation2 + $0xb8] sm:$0xff] }
  0x22   :  { %292 = vmatprep.subr.mxu1 %v146_v9  ;;  %222 = vmatpush1.msra.mxu0 %v81_v10  ;;  %v142_v17 = vld [vmem:[#allocation2 + $0x2b8] sm:$0xff]  ;;  %v77_v18 = vld [vmem:[#allocation2 + $0xb0] sm:$0xff]  ;;  %v76_v20 = vld [vmem:[#allocation2 + $0xa8] sm:$0xff] }
  0x23   :  { %293 = vmatpush1.msra.mxu1 %v145_v11  ;;  %223 = vmatprep.subr.mxu0 %v80_v12  ;;  %v141_v19 = vld [vmem:[#allocation2 + $0x2b0] sm:$0xff]  ;;  %v140_v21 = vld [vmem:[#allocation2 + $0x2a8] sm:$0xff]  ;;  %v75_v22 = vld [vmem:[#allocation2 + $0xa0] sm:$0xff] }
  0x24   :  { %294 = vmatprep.subr.mxu1 %v144_v13  ;;  %224 = vmatpush1.msra.mxu0 %v79_v14  ;;  %v139_v23 = vld [vmem:[#allocation2 + $0x2a0] sm:$0xff]  ;;  %v74_v24 = vld [vmem:[#allocation2 + $0x98] sm:$0xff]  ;;  %v73_v26 = vld [vmem:[#allocation2 + $0x90] sm:$0xff] }
  0x25   :  { %295 = vmatpush1.msra.mxu1 %v143_v15  ;;  %225 = vmatprep.subr.mxu0 %v78_v16  ;;  %v138_v25 = vld [vmem:[#allocation2 + $0x298] sm:$0xff]  ;;  %v137_v27 = vld [vmem:[#allocation2 + $0x290] sm:$0xff]  ;;  %v72_v28 = vld [vmem:[#allocation2 + $0x88] sm:$0xff] }
  0x26   :  { %296 = vmatprep.subr.mxu1 %v142_v17  ;;  %226 = vmatpush1.msra.mxu0 %v77_v18  ;;  %v136_v29 = vld [vmem:[#allocation2 + $0x288] sm:$0xff]  ;;  %v71_v30 = vld [vmem:[#allocation2 + $0x80] sm:$0xff]  ;;  %v70_v32 = vld [vmem:[#allocation2 + $0x78] sm:$0xff] }
  0x27   :  { %297 = vmatpush1.msra.mxu1 %v141_v19  ;;  %227 = vmatprep.subr.mxu0 %v76_v20  ;;  %v135_v31 = vld [vmem:[#allocation2 + $0x280] sm:$0xff]  ;;  %v134_v33 = vld [vmem:[#allocation2 + $0x278] sm:$0xff]  ;;  %v69_v34 = vld [vmem:[#allocation2 + $0x70] sm:$0xff] }
  0x28   :  { %298 = vmatprep.subr.mxu1 %v140_v21  ;;  %228 = vmatpush1.msra.mxu0 %v75_v22  ;;  %v133_v35 = vld [vmem:[#allocation2 + $0x270] sm:$0xff]  ;;  %v68_v36 = vld [vmem:[#allocation2 + $0x68] sm:$0xff]  ;;  %v67_v38 = vld [vmem:[#allocation2 + $0x60] sm:$0xff] }
  0x29   :  { %299 = vmatpush1.msra.mxu1 %v139_v23  ;;  %229 = vmatprep.subr.mxu0 %v74_v24  ;;  %v132_v37 = vld [vmem:[#allocation2 + $0x268] sm:$0xff]  ;;  %v131_v39 = vld [vmem:[#allocation2 + $0x260] sm:$0xff]  ;;  %v66_v40 = vld [vmem:[#allocation2 + $0x58] sm:$0xff] }
  0x2a   :  { %300 = vmatprep.subr.mxu1 %v138_v25  ;;  %230 = vmatpush1.msra.mxu0 %v73_v26  ;;  %v130_v41 = vld [vmem:[#allocation2 + $0x258] sm:$0xff]  ;;  %v65_v42 = vld [vmem:[#allocation2 + $0x50] sm:$0xff]  ;;  %v64_v44 = vld [vmem:[#allocation2 + $0x48] sm:$0xff] }
  0x2b   :  { %301 = vmatpush1.msra.mxu1 %v137_v27  ;;  %231 = vmatprep.subr.mxu0 %v72_v28  ;;  %v129_v43 = vld [vmem:[#allocation2 + $0x250] sm:$0xff]  ;;  %v128_v45 = vld [vmem:[#allocation2 + $0x248] sm:$0xff]  ;;  %v63_v46 = vld [vmem:[#allocation2 + $0x40] sm:$0xff] }
  0x2c   :  { %302 = vmatprep.subr.mxu1 %v136_v29  ;;  %232 = vmatpush1.msra.mxu0 %v71_v30  ;;  %v127_v47 = vld [vmem:[#allocation2 + $0x240] sm:$0xff]  ;;  %v62_v48 = vld [vmem:[#allocation2 + $0x38] sm:$0xff]  ;;  %v61_v50 = vld [vmem:[#allocation2 + $0x30] sm:$0xff]  ;;  %v185_v30 = vlaneseq }
  0x2d   :  { %303 = vmatpush1.msra.mxu1 %v135_v31  ;;  %233 = vmatprep.subr.mxu0 %v70_v32  ;;  %v126_v49 = vld [vmem:[#allocation2 + $0x238] sm:$0xff]  ;;  %v125_v51 = vld [vmem:[#allocation2 + $0x230] sm:$0xff]  ;;  %v60_v52 = vld [vmem:[#allocation2 + $0x28] sm:$0xff]  ;;  %v600_v31 = vmov 1983009808  }
  0x2e   :  { %304 = vmatprep.subr.mxu1 %v134_v33  ;;  %234 = vmatpush1.msra.mxu0 %v69_v34  ;;  %v124_v53 = vld [vmem:[#allocation2 + $0x228] sm:$0xff]  ;;  %v59_v54 = vld [vmem:[#allocation2 + $0x20] sm:$0xff]  ;;  %v58_v56 = vld [vmem:[#allocation2 + $0x18] sm:$0xff]  ;;  %v198_v32 = vunpack.c.l.s4 %v600_v31 }
  0x2f   :  { %305 = vmatpush1.msra.mxu1 %v133_v35  ;;  %235 = vmatprep.subr.mxu0 %v68_v36  ;;  %v123_v55 = vld [vmem:[#allocation2 + $0x220] sm:$0xff]  ;;  %v122_v57 = vld [vmem:[#allocation2 + $0x218] sm:$0xff]  ;;  %v57_v58 = vld [vmem:[#allocation2 + $0x10] sm:$0xff] }
  0x30   :  { %306 = vmatprep.subr.mxu1 %v132_v37  ;;  %236 = vmatpush1.msra.mxu0 %v67_v38  ;;  %v121_v59 = vld [vmem:[#allocation2 + $0x210] sm:$0xff]  ;;  %v56_v60 = vld [vmem:[#allocation2 + $0x8] sm:$0xff]  ;;  %v55_v62 = vld [vmem:[#allocation2] sm:$0xff] }
  0x31   :  { %307 = vmatpush1.msra.mxu1 %v131_v39  ;;  %237 = vmatprep.subr.mxu0 %v66_v40  ;;  %v120_v61 = vld [vmem:[#allocation2 + $0x208] sm:$0xff]  ;;  %v119_v63 = vld [vmem:[#allocation2 + $0x200] sm:$0xff]  ;;  %v118_v0 = vld [vmem:[#allocation2 + $0x1f8] sm:$0xff] }
  0x32   :  { %308 = vmatprep.subr.mxu1 %v130_v41  ;;  %238 = vmatpush1.msra.mxu0 %v65_v42  ;;  %v182_v1 = vld [vmem:[#allocation2 + $0x3f8] sm:$0xff]  ;;  %v117_v2 = vld [vmem:[#allocation2 + $0x1f0] sm:$0xff]  ;;  %v116_v4 = vld [vmem:[#allocation2 + $0x1e8] sm:$0xff]  ;;  %v647_v41 = vshrl.u32 %v185_v30, 7  ;;  %v199_v42 = vunpack.c.0.s8 %v198_v32 }
  0x33   :  { %309 = vmatpush1.msra.mxu1 %v129_v43  ;;  %239 = vmatprep.subr.mxu0 %v64_v44  ;;  %v181_v3 = vld [vmem:[#allocation2 + $0x3f0] sm:$0xff]  ;;  %v180_v5 = vld [vmem:[#allocation2 + $0x3e8] sm:$0xff]  ;;  %v115_v6 = vld [vmem:[#allocation2 + $0x1e0] sm:$0xff] }
  0x34   :  { %310 = vmatprep.subr.mxu1 %v128_v45  ;;  %240 = vmatpush1.msra.mxu0 %v63_v46  ;;  %v179_v7 = vld [vmem:[#allocation2 + $0x3e0] sm:$0xff]  ;;  %v114_v8 = vld [vmem:[#allocation2 + $0x1d8] sm:$0xff]  ;;  %v113_v10 = vld [vmem:[#allocation2 + $0x1d0] sm:$0xff] }
  0x35   :  { %311 = vmatpush1.msra.mxu1 %v127_v47  ;;  %241 = vmatprep.subr.mxu0 %v62_v48  ;;  %v178_v9 = vld [vmem:[#allocation2 + $0x3d8] sm:$0xff]  ;;  %v177_v11 = vld [vmem:[#allocation2 + $0x3d0] sm:$0xff]  ;;  %v112_v12 = vld [vmem:[#allocation2 + $0x1c8] sm:$0xff] }
  0x36   :  { %312 = vmatprep.subr.mxu1 %v126_v49  ;;  %242 = vmatpush1.msra.mxu0 %v61_v50  ;;  %v176_v13 = vld [vmem:[#allocation2 + $0x3c8] sm:$0xff]  ;;  %v111_v14 = vld [vmem:[#allocation2 + $0x1c0] sm:$0xff]  ;;  %v110_v16 = vld [vmem:[#allocation2 + $0x1b8] sm:$0xff] }
  0x37   :  { %313 = vmatpush1.msra.mxu1 %v125_v51  ;;  %243 = vmatprep.subr.mxu0 %v60_v52  ;;  %v175_v15 = vld [vmem:[#allocation2 + $0x3c0] sm:$0xff]  ;;  %v174_v17 = vld [vmem:[#allocation2 + $0x3b8] sm:$0xff]  ;;  %v109_v18 = vld [vmem:[#allocation2 + $0x1b0] sm:$0xff]  ;;  %v202_v52 = vsub.s32 %v199_v42, %v647_v41 }
  0x38   :  { %314 = vmatprep.subr.mxu1 %v124_v53  ;;  %244 = vmatpush1.msra.mxu0 %v59_v54  ;;  %v173_v19 = vld [vmem:[#allocation2 + $0x3b0] sm:$0xff]  ;;  %v108_v20 = vld [vmem:[#allocation2 + $0x1a8] sm:$0xff]  ;;  %v107_v22 = vld [vmem:[#allocation2 + $0x1a0] sm:$0xff] }
  0x39   :  { %315 = vmatpush1.msra.mxu1 %v123_v55  ;;  %245 = vmatprep.subr.mxu0 %v58_v56  ;;  %v172_v21 = vld [vmem:[#allocation2 + $0x3a8] sm:$0xff]  ;;  %v171_v23 = vld [vmem:[#allocation2 + $0x3a0] sm:$0xff]  ;;  %v106_v24 = vld [vmem:[#allocation2 + $0x198] sm:$0xff] }
  0x3a   :  { %316 = vmatprep.subr.mxu1 %v122_v57  ;;  %246 = vmatpush1.msra.mxu0 %v57_v58  ;;  %v170_v25 = vld [vmem:[#allocation2 + $0x398] sm:$0xff]  ;;  %v105_v26 = vld [vmem:[#allocation2 + $0x190] sm:$0xff]  ;;  %v104_v28 = vld [vmem:[#allocation2 + $0x188] sm:$0xff] }
  0x3b   :  { %317 = vmatpush1.msra.mxu1 %v121_v59  ;;  %247 = vmatprep.subr.mxu0 %v56_v60  ;;  %v169_v27 = vld [vmem:[#allocation2 + $0x390] sm:$0xff]  ;;  %v168_v29 = vld [vmem:[#allocation2 + $0x388] sm:$0xff]  ;;  %v103_v33 = vld [vmem:[#allocation2 + $0x180] sm:$0xff] }
  0x3c   :  { %318 = vmatprep.subr.mxu1 %v120_v61  ;;  %248 = vmatpush1.msra.mxu0 %v55_v62  ;;  %v167_v34 = vld [vmem:[#allocation2 + $0x380] sm:$0xff]  ;;  %v102_v35 = vld [vmem:[#allocation2 + $0x178] sm:$0xff]  ;;  %v101_v37 = vld [vmem:[#allocation2 + $0x170] sm:$0xff] }
  0x3d   :  { %319 = vmatpush1.msra.mxu1 %v119_v63  ;;  %249 = vmatprep.subr.mxu0 %v118_v0  ;;  %v166_v36 = vld [vmem:[#allocation2 + $0x378] sm:$0xff]  ;;  %v165_v38 = vld [vmem:[#allocation2 + $0x370] sm:$0xff]  ;;  %v100_v39 = vld [vmem:[#allocation2 + $0x168] sm:$0xff] }
  0x3e   :  { %320 = vmatprep.subr.mxu1 %v182_v1  ;;  %250 = vmatpush2.msra.mxu0 %v117_v2  ;;  %v164_v40 = vld [vmem:[#allocation2 + $0x368] sm:$0xff]  ;;  %v99_v43 = vld [vmem:[#allocation2 + $0x160] sm:$0xff]  ;;  %v98_v45 = vld [vmem:[#allocation2 + $0x158] sm:$0xff] }
  0x3f   :  { %321 = vmatpush2.msra.mxu1 %v181_v3  ;;  %251 = vmatprep.subr.mxu0 %v116_v4  ;;  %v163_v44 = vld [vmem:[#allocation2 + $0x360] sm:$0xff]  ;;  %v162_v46 = vld [vmem:[#allocation2 + $0x358] sm:$0xff]  ;;  %v97_v48 = vld [vmem:[#allocation2 + $0x150] sm:$0xff] }
  0x40   :  { %322 = vmatprep.subr.mxu1 %v180_v5  ;;  %252 = vmatpush2.msra.mxu0 %v115_v6  ;;  %v54_v47 = vld [vmem:[%s670_s0] sm:$0xff]  ;;  %v161_v49 = vld [vmem:[#allocation2 + $0x350] sm:$0xff]  ;;  %v96_v50 = vld [vmem:[#allocation2 + $0x148] sm:$0xff] }
  0x41   :  { %323 = vmatpush2.msra.mxu1 %v179_v7  ;;  %253 = vmatprep.subr.mxu0 %v114_v8  ;;  %v160_v51 = vld [vmem:[#allocation2 + $0x348] sm:$0xff]  ;;  %v95_v53 = vld [vmem:[#allocation2 + $0x140] sm:$0xff]  ;;  %v196_v55 = vcombine.high %v54_v47, %v54_v47  ;;  %v94_v56 = vld [vmem:[#allocation2 + $0x138] sm:$0xff]  ;;  %v203_v62 = vrot.slane %v54_v47, %v202_v52  ;;  %v191_v47 = vsub.s32 1, %v647_v41 }
  0x42   :  { %324 = vmatprep.subr.mxu1 %v178_v9  ;;  %254 = vmatpush2.msra.mxu0 %v113_v10  ;;  %v159_v54 = vld [vmem:[#allocation2 + $0x340] sm:$0xff]  ;;  %v158_v57 = vld [vmem:[#allocation2 + $0x338] sm:$0xff]  ;;  %v93_v58 = vld [vmem:[#allocation2 + $0x130] sm:$0xff] }
  0x43   :  { %325 = vmatpush2.msra.mxu1 %v177_v11  ;;  %255 = vmatprep.subr.mxu0 %v112_v12  ;;  %v157_v59 = vld [vmem:[#allocation2 + $0x330] sm:$0xff]  ;;  %v92_v60 = vld [vmem:[#allocation2 + $0x128] sm:$0xff]  ;;  %v91_v63 = vld [vmem:[#allocation2 + $0x120] sm:$0xff]  ;;  %v210_v1 = vrot.slane %v196_v55, %v202_v52  ;;  %v211_v8 = vcombine.high %v203_v62, %v203_v62 }
  0x44   :  { %326 = vmatprep.subr.mxu1 %v176_v13  ;;  %256 = vmatpush2.msra.mxu0 %v111_v14  ;;  %v156_v61 = vld [vmem:[#allocation2 + $0x328] sm:$0xff]  ;;  %v155_v0 = vld [vmem:[#allocation2 + $0x320] sm:$0xff]  ;;  %v90_v2 = vld [vmem:[#allocation2 + $0x118] sm:$0xff] }
  0x45   :  { %327 = vmatpush2.msra.mxu1 %v175_v15  ;;  %257 = vmatprep.subr.mxu0 %v110_v16  ;;  %v154_v3 = vld [vmem:[#allocation2 + $0x318] sm:$0xff]  ;;  %v89_v4 = vld [vmem:[#allocation2 + $0x110] sm:$0xff]  ;;  %v88_v6 = vld [vmem:[#allocation2 + $0x108] sm:$0xff]  ;;  %v212_v10 = vcombine.high %v210_v1, %v210_v1 }
  0x46   :  { %328 = vmatprep.subr.mxu1 %v174_v17  ;;  %258 = vmatpush2.msra.mxu0 %v109_v18  ;;  %v153_v5 = vld [vmem:[#allocation2 + $0x310] sm:$0xff]  ;;  %v152_v7 = vld [vmem:[#allocation2 + $0x308] sm:$0xff]  ;;  %v87_v9 = vld [vmem:[#allocation2 + $0x100] sm:$0xff] }
  0x47   :  { %329 = vmatpush2.msra.mxu1 %v173_v19  ;;  %259 = vmatprep.subr.mxu0 %v108_v20  ;;  %v151_v11 = vld [vmem:[#allocation2 + $0x300] sm:$0xff]  ;;  %v425_v12 = vld [vmem:[#allocation4 + $0xf8] sm:$0xff]  ;;  %v424_v14 = vld [vmem:[#allocation4 + $0xf0] sm:$0xff] }
  0x48   :  { %330 = vmatprep.subr.mxu1 %v172_v21  ;;  %260 = vmatpush2.msra.mxu0 %v107_v22  ;;  %v409_v13 = vld [vmem:[#allocation4 + $0x78] sm:$0xff]  ;;  %v408_v15 = vld [vmem:[#allocation4 + $0x70] sm:$0xff]  ;;  %v423_v16 = vld [vmem:[#allocation4 + $0xe8] sm:$0xff] }
  0x49   :  { %331 = vmatpush2.msra.mxu1 %v171_v23  ;;  %261 = vmatprep.subr.mxu0 %v106_v24  ;;  %v407_v17 = vld [vmem:[#allocation4 + $0x68] sm:$0xff]  ;;  %v422_v18 = vld [vmem:[#allocation4 + $0xe0] sm:$0xff]  ;;  %v421_v20 = vld [vmem:[#allocation4 + $0xd8] sm:$0xff] }
  0x4a   :  { %332 = vmatprep.subr.mxu1 %v170_v25  ;;  %262 = vmatpush2.msra.mxu0 %v105_v26  ;;  %v406_v19 = vld [vmem:[#allocation4 + $0x60] sm:$0xff]  ;;  %v405_v21 = vld [vmem:[#allocation4 + $0x58] sm:$0xff]  ;;  %v420_v22 = vld [vmem:[#allocation4 + $0xd0] sm:$0xff] }
  0x4b   :  { %333 = vmatpush2.msra.mxu1 %v169_v27  ;;  %263 = vmatprep.subr.mxu0 %v104_v28  ;;  %v404_v23 = vld [vmem:[#allocation4 + $0x50] sm:$0xff]  ;;  %v419_v24 = vld [vmem:[#allocation4 + $0xc8] sm:$0xff]  ;;  %v418_v26 = vld [vmem:[#allocation4 + $0xc0] sm:$0xff] }
  0x4c   :  { %334 = vmatprep.subr.mxu1 %v168_v29  ;;  %264 = vmatpush2.msra.mxu0 %v103_v33  ;;  %v403_v25 = vld [vmem:[#allocation4 + $0x48] sm:$0xff]  ;;  %v402_v27 = vld [vmem:[#allocation4 + $0x40] sm:$0xff]  ;;  %v417_v28 = vld [vmem:[#allocation4 + $0xb8] sm:$0xff] }
  0x4d   :  { %335 = vmatpush2.msra.mxu1 %v167_v34  ;;  %265 = vmatprep.subr.mxu0 %v102_v35  ;;  %v401_v29 = vld [vmem:[#allocation4 + $0x38] sm:$0xff]  ;;  %v416_v30 = vld [vmem:[#allocation4 + $0xb0] sm:$0xff]  ;;  %v415_v32 = vld [vmem:[#allocation4 + $0xa8] sm:$0xff] }
  0x4e   :  { %336 = vmatprep.subr.mxu1 %v166_v36  ;;  %266 = vmatpush2.msra.mxu0 %v101_v37  ;;  %v400_v31 = vld [vmem:[#allocation4 + $0x30] sm:$0xff]  ;;  %v399_v33 = vld [vmem:[#allocation4 + $0x28] sm:$0xff]  ;;  %v414_v34 = vld [vmem:[#allocation4 + $0xa0] sm:$0xff] }
  0x4f   :  { %337 = vmatpush2.msra.mxu1 %v165_v38  ;;  %267 = vmatprep.subr.mxu0 %v100_v39  ;;  %v398_v35 = vld [vmem:[#allocation4 + $0x20] sm:$0xff]  ;;  %v413_v36 = vld [vmem:[#allocation4 + $0x98] sm:$0xff]  ;;  %v412_v38 = vld [vmem:[#allocation4 + $0x90] sm:$0xff] }
  0x50   :  { %338 = vmatprep.subr.mxu1 %v164_v40  ;;  %268 = vmatpush2.msra.mxu0 %v99_v43  ;;  %v397_v37 = vld [vmem:[#allocation4 + $0x18] sm:$0xff]  ;;  %v396_v39 = vld [vmem:[#allocation4 + $0x10] sm:$0xff]  ;;  %v411_v40 = vld [vmem:[#allocation4 + $0x88] sm:$0xff] }
  0x51   :  { %339 = vmatpush2.msra.mxu1 %v163_v44  ;;  %269 = vmatprep.subr.mxu0 %v98_v45  ;;  %v395_v42 = vld [vmem:[#allocation4 + $0x8] sm:$0xff]  ;;  %v410_v43 = vld [vmem:[#allocation4 + $0x80] sm:$0xff]  ;;  %v187_v45 = vsub.s32 0, %v647_v41 }
  0x52   :  { %340 = vmatprep.subr.mxu1 %v162_v46  ;;  %270 = vmatpush2.msra.mxu0 %v97_v48  ;;  %v394_v44 = vld [vmem:[#allocation4] sm:$0xff] }
  0x53   :  { %341 = vmatpush2.msra.mxu1 %v161_v49  ;;  %271 = vmatprep.subr.mxu0 %v96_v50  ;;  %v183_v46 = vld [vmem:[%s672_s2] sm:$0x3] }
  0x54   :  { %342 = vmatprep.subr.mxu1 %v160_v51  ;;  %272 = vmatpush2.msra.mxu0 %v95_v53  ;;  %v188_v48 = vrot.slane %v183_v46, %v187_v45  ;;  %v192_v49 = vrot.slane %v183_v46, %v191_v47 }
  0x55   :  { %343 = vmatpush2.msra.mxu1 %v159_v54  ;;  %273 = vmatprep.subr.mxu0 %v94_v56  ;;  %v361_v56 = vld [vmem:[%s673_s3] sm:$0xff] }
  0x56   :  { %344 = vmatprep.subr.mxu1 %v158_v57  ;;  %274 = vmatpush2.msra.mxu0 %v93_v58 }
  0x57   :  { %345 = vmatpush2.msra.mxu1 %v157_v59  ;;  %275 = vmatprep.subr.mxu0 %v92_v60 }
  0x58   :  { %346 = vmatprep.subr.mxu1 %v156_v61  ;;  %276 = vmatpush2.msra.mxu0 %v91_v63 }
  0x59   :  { %347 = vmatpush2.msra.mxu1 %v155_v0  ;;  %277 = vmatprep.subr.mxu0 %v90_v2 }
  0x5a   :  { %348 = vmatprep.subr.mxu1 %v154_v3  ;;  %278 = vmatpush2.msra.mxu0 %v89_v4 }
  0x5b   :  { %349 = vmatpush2.msra.mxu1 %v153_v5  ;;  %279 = vmatprep.subr.mxu0 %v88_v6 }
  0x5c   :  { %350 = vmatprep.subr.mxu1 %v152_v7  ;;  %280 = vmatpush2.msra.mxu0 %v87_v9 }
  0x5d   :  { %281 = vmatprep.mubr.f32.mxu0 %v211_v8  ;;  %351 = vmatpush2.msra.mxu1 %v151_v11 }
  0x5e   :  { %352 = vmatprep.mubr.f32.mxu1 %v212_v10  ;;  %282 = vmatmul.mubr.f32.vlgmr.msra.gmra.mxu0 %v203_v62  ;;  %v371_v62 = vcombine.high %v361_v56, %v361_v56  ;;  %v426_v10 = vld [vmem:[%s675_s5] sm:$0xff] }
  0x5f   :  { %353 = vmatmul.mubr.f32.vlgmr.msra.gmra.mxu1 %v210_v1  ;;  %506 = vmatprep.subr.mxu0 %v425_v12 }
  0x60   :  { %507 = vmatpush3.msra.mxu0 %v409_v13  ;;  %v497_v13 = vld [vmem:[%s676_s6] sm:$0xff] }
  0x61   :  { %508 = vmatprep.subr.mxu0 %v424_v14 }
  0x62   :  { %509 = vmatpush3.msra.mxu0 %v408_v15 }
  0x63   :  { %510 = vmatprep.subr.mxu0 %v423_v16 }
  0x64   :  { %511 = vmatpush3.msra.mxu0 %v407_v17 }
  0x65   :  { %512 = vmatprep.subr.mxu0 %v422_v18 }
  0x66   :  { %513 = vmatpush3.msra.mxu0 %v406_v19 }
  0x67   :  { %514 = vmatprep.subr.mxu0 %v421_v20 }
  0x68   :  { %515 = vmatpush3.msra.mxu0 %v405_v21 }
  0x69   :  { %516 = vmatprep.subr.mxu0 %v420_v22 }
  0x6a   :  { %517 = vmatpush3.msra.mxu0 %v404_v23 }
  0x6b   :  { %518 = vmatprep.subr.mxu0 %v419_v24 }
  0x6c   :  { %519 = vmatpush3.msra.mxu0 %v403_v25 }
  0x6d   :  { %520 = vmatprep.subr.mxu0 %v418_v26 }
  0x6e   :  { %521 = vmatpush3.msra.mxu0 %v402_v27 }
  0x6f   :  { %522 = vmatprep.subr.mxu0 %v417_v28 }
  0x70   :  { %523 = vmatpush3.msra.mxu0 %v401_v29 }
  0x71   :  { %524 = vmatprep.subr.mxu0 %v416_v30 }
  0x72   :  { %525 = vmatpush3.msra.mxu0 %v400_v31 }
  0x73   :  { %526 = vmatprep.subr.mxu0 %v415_v32 }
  0x74   :  { %527 = vmatpush3.msra.mxu0 %v399_v33 }
  0x75   :  { %528 = vmatprep.subr.mxu0 %v414_v34 }
  0x76   :  { %529 = vmatpush3.msra.mxu0 %v398_v35 }
  0x77   :  { %530 = vmatprep.subr.mxu0 %v413_v36 }
  0x78   :  { %531 = vmatpush3.msra.mxu0 %v397_v37 }
  0x79   :  { %532 = vmatprep.subr.mxu0 %v412_v38 }
  0x7a   :  { %533 = vmatpush3.msra.mxu0 %v396_v39 }
  0x7b   :  { %534 = vmatprep.subr.mxu0 %v411_v40 }
  0x7c   :  { %535 = vmatpush3.msra.mxu0 %v395_v42 }
  0x7d   :  { %536 = vmatprep.subr.mxu0 %v410_v43 }
  0x7e   :  { %537 = vmatpush3.msra.mxu0 %v394_v44 }
 0x11e   :  { %v283_v50 = vpop.f32.mrf.mxu0 }
 0x11f   :  { %v354_v51 = vpop.f32.mrf.mxu1  ;;  %v284_v52 = vadd.f32 %v283_v50, %v188_v48 }
 0x120   :  { %v285_v53 = vpop.f32.mrf.mxu0 }
 0x121   :  { %v355_v54 = vadd.f32 %v354_v51, %v284_v52  ;;  %v286_v55 = vadd.f32 %v285_v53, %v192_v49  ;;  %v356_v57 = vpop.f32.mrf.mxu1 }
 0x123   :  { %v359_v58 = vmax.f32 %v355_v54, 0.0  ;;  %v357_v59 = vadd.f32 %v356_v57, %v286_v55 }
 0x125   :  { %v378_v60 = vrot.slane %v359_v58, %v191_v47  ;;  %v360_v61 = vmax.f32 %v357_v59, 0.0  ;;  %v365_v1 = vrot.slane %v359_v58, %v187_v45 }
 0x127   :  { %v383_v63 = vmul.f32 %v378_v60, %v361_v56  ;;  %v369_v41 = vrot.slane %v360_v61, %v187_v45  ;;  %v382_v0 = vrot.slane %v360_v61, %v191_v47  ;;  %v373_v6 = vmul.f32 %v365_v1, %v361_v56 }
 0x129   :  { %v384_v2 = vmul.f32 %v382_v0, %v371_v62  ;;  %v387_v3 = vrot.slane %v383_v63, 4  ;;  %v374_v4 = vmul.f32 %v371_v62, %v369_v41 }
 0x12b   :  { %v388_v5 = vrot.slane %v384_v2, 4  ;;  %v392_v8 = vsel %vm391_vm0, %v373_v6, %v387_v3 }
 0x12d   :  { %v393_v7 = vsel %vm391_vm0, %v374_v4, %v388_v5 }
 0x12e   :  { %491 = vmatprep.mubr.f32.mxu0 %v393_v7 }
 0x12f   :  { %492 = vmatmul.mubr.f32.vlgmr.msra.gmra.mxu0 %v392_v8 }
 0x1ef   :  { %v538_v9 = vpop.f32.mrf.mxu0 }
 0x1f1   :  { %v539_v11 = vpop.f32.mrf.mxu0 }
 0x1f2   :  { %v540_v12 = vadd.f32 %v539_v11, %v538_v9 }
 0x1f4   :  { %v494_v14 = vadd.f32 %v540_v12, %v426_v10 }
 0x1f6   :  { %v498_v15 = vmul.f32 %v497_v13, %v494_v14 }
 0x1f8   :  { %499 = vst [vmem:[%s677_s7] sm:$0xff] %v498_v15 }
 0x1f9   :  { %504 = vsyncpa [#allocation3], 1 }
 0x1fa   :  { %505 = vsyncpa [#allocation5], 1 }

</bundles_post_ra>
